<compile_context>
chip_gen: v5e
topology: v5e:2x2
jax: 0.10.0
libtpu: 0.0.40
codegen_flags: <defaults>
</compile_context>

<pallas_src>
import functools

import jax
import jax.numpy as jnp
import numpy as np
from jax import lax
from jax.experimental import pallas as pl
from jax.experimental.pallas import tpu as pltpu

_LANE = 128
_SUBLANE = 8
# Per-TensorCore VMEM compute budget used for tile sizing (bytes).  Kept well
# under the v7x scoped default (32 MiB) so the same sizing works on v5e/v6e/v7x.
_VMEM_BUDGET = 24 * 1024 * 1024


def make_lpf_filter(window_size: int) -> np.ndarray:
    """Deterministic construction matching LPF.__init__ (a registered buffer)."""
    W = window_size
    lin = np.linspace(-128.0, 128.0, W + 1)
    freq = 1.0 / (np.roll(lin, W // 2) ** 2 + 1.0)
    filt = np.roll(np.fft.ifft(freq).real, W // 2)
    return filt.astype(np.float32)


def make_lpf_toeplitz(window_size: int, length: int, n_pad: int) -> np.ndarray:
    """Banded Toeplitz matrix T (length, n_pad) such that  x @ T == LPF(x).

    The torch forward zero-pads x by W//2 on each side; those zero rows of the
    padded input contribute nothing, so the padding is absorbed into T's band
    structure and the kernel never materializes a padded copy of x.
    Columns >= L_out are zero (pure lane padding for dense stores).
    """
    W = window_size
    pad = W // 2
    L_out = length + 2 * pad - W
    filt = make_lpf_filter(W)
    i = np.arange(length)[:, None]     # input time index
    j = np.arange(n_pad)[None, :]      # output time index
    k = i - j + pad                    # filter tap index
    valid = (k >= 0) & (k <= W) & (j < L_out)
    return np.where(valid, filt[np.clip(k, 0, W)], 0.0).astype(np.float32)


def _lpf_kernel(x_ref, t_ref, o_ref, *, precision):
    """One MXU matmul per tile: (row_tile, L) @ (L, col_tile) -> (row_tile, col_tile)."""
    o_ref[...] = jnp.dot(
        x_ref[...],
        t_ref[...],
        preferred_element_type=jnp.float32,
        precision=precision,
    ).astype(o_ref.dtype)


def lpf_forward(x: jnp.ndarray, window_size: int) -> jnp.ndarray:
    """Pallas implementation of LPF.forward for x of shape (..., L)."""
    W = window_size
    pad = W // 2
    orig_shape = x.shape
    L = orig_shape[-1]
    lead = orig_shape[:-1]
    R = int(np.prod(lead)) if lead else 1
    L_out = L + 2 * pad - W  # == L for even W, L-1 for odd W

    # Lane-dense output: pad the output time axis up to a multiple of 128 by
    # adding zero columns to the compile-time Toeplitz matrix.
    N_pad = max(_LANE, pl.cdiv(L_out, _LANE) * _LANE)

    dtype = x.dtype
    t_dtype = jnp.bfloat16 if dtype == jnp.bfloat16 else jnp.float32
    T = jnp.asarray(make_lpf_toeplitz(W, L, N_pad), dtype=t_dtype)
    # Full-f32 MXU passes for f32 inputs; bf16 inputs use the native bf16 path.
    precision = (lax.Precision.HIGHEST if dtype == jnp.float32
                 else lax.Precision.DEFAULT)

    # ---- tile sizing -------------------------------------------------------
    itemsize = jnp.dtype(dtype).itemsize
    t_itemsize = jnp.dtype(t_dtype).itemsize

    # Column tile of the (padded) output / Toeplitz matrix.
    col_tile = int(min(N_pad, 4 * _LANE))                       # 512 lanes max
    # TODO(synk): for very long L the (L x col_tile) Toeplitz block itself can
    # exceed VMEM; a band-aware time tiling of the contraction axis would be
    # needed there (typical LPF sequence lengths fit comfortably).
    t_block_bytes = 2 * L * col_tile * t_itemsize               # double-buffered T
    per_row = 2 * (L * itemsize + col_tile * itemsize)          # dbl-buffered in+out
    rows_fit = max((_VMEM_BUDGET - t_block_bytes) // max(per_row, 1), _SUBLANE)
    row_tile = int(min(512, rows_fit, pl.cdiv(R, _SUBLANE) * _SUBLANE))
    row_tile = max(_SUBLANE, (row_tile // _SUBLANE) * _SUBLANE)

    grid_rows = pl.cdiv(R, row_tile)
    grid_cols = N_pad // col_tile
    R_pad = grid_rows * row_tile

    x2 = x.reshape(R, L)
    if R_pad != R:
        # Only the small ragged row remainder is padded; the time axis never is.
        x2 = jnp.pad(x2, ((0, R_pad - R), (0, 0)))

    out = pl.pallas_call(
        functools.partial(_lpf_kernel, precision=precision),
        out_shape=jax.ShapeDtypeStruct((R_pad, N_pad), dtype),
        grid_spec=pltpu.PrefetchScalarGridSpec(
            num_scalar_prefetch=0,
            # Column axis last: the x row-block index is constant across it, so
            # the input tile is not re-DMA'd between column steps.
            grid=(grid_rows, grid_cols),
            in_specs=[
                # input rows: tile over rows, full time (contraction) axis
                pl.BlockSpec((row_tile, L), lambda i, j: (i, 0)),
                # banded filter matrix: tile over output columns only
                pl.BlockSpec((L, col_tile), lambda i, j: (0, j)),
            ],
            out_specs=pl.BlockSpec((row_tile, col_tile), lambda i, j: (i, j)),
        ),
        compiler_params=pltpu.CompilerParams(
            dimension_semantics=("parallel", "parallel"),  # megacore sharding
            vmem_limit_bytes=32 * 1024 * 1024,             # safe on all generations
        ),
    )(x2, T)

    if R_pad != R or N_pad != L_out:
        out = out[:R, :L_out]
    return out.reshape(lead + (L_out,))


def lpf_reference(x: jnp.ndarray, filt: jnp.ndarray, window_size: int) -> jnp.ndarray:
    """Pure-JAX reference mirroring torch pad + as_strided + matmul (f32 accumulate)."""
    W = window_size
    pad = W // 2
    xp = jnp.pad(x, [(0, 0)] * (x.ndim - 1) + [(pad, pad)])
    L_out = xp.shape[-1] - W
    out = jnp.zeros(x.shape[:-1] + (L_out,), jnp.float32)
    for k in range(W + 1):
        out = out + filt[k].astype(jnp.float32) * xp[..., k:k + L_out].astype(jnp.float32)
    return out.astype(x.dtype)


if __name__ == "__main__":
    window_size = 8  # even -> output length == input length (typical use)
    key = jax.random.PRNGKey(0)
    x = jax.random.normal(key, (2, 4, 256), dtype=jnp.float32)  # (B, C, L)

    lpf = jax.jit(functools.partial(lpf_forward, window_size=window_size))
    out = jax.block_until_ready(lpf(x))

    filt = jnp.asarray(make_lpf_filter(window_size))
    ref = lpf_reference(x, filt, window_size)

    assert out.shape == ref.shape == (2, 4, 256)
    np.testing.assert_allclose(np.asarray(out), np.asarray(ref),
                               rtol=1e-4, atol=1e-5)
    print("KERNEL_OK")
</pallas_src>

<mosaic_0001>
module attributes {stable_mosaic.version = 11 : i64} {
  func.func @_lpf_kernel(%arg0: i32, %arg1: i32, %arg2: memref<8x256xf32, #tpu.memory_space<vmem>>, %arg3: memref<256x256xf32, #tpu.memory_space<vmem>>, %arg4: memref<8x256xf32, #tpu.memory_space<vmem>>) attributes {dimension_semantics = [#tpu.dimension_semantics<parallel>, #tpu.dimension_semantics<parallel>], iteration_bounds = array<i64: 1, 1>, scalar_prefetch = 0 : i64, scratch_operands = 0 : i64, tpu.core_type = #tpu.core_type<tc>, window_params = [{transform_indices = @transform_0, window_bounds = array<i64: 8, 256>}, {transform_indices = @transform_1, window_bounds = array<i64: 256, 256>}, {transform_indices = @transform_2, window_bounds = array<i64: 8, 256>}]} {
    %c0 = arith.constant 0 : index
    %c0_0 = arith.constant 0 : index
    %0 = vector.load %arg2[%c0, %c0_0] : memref<8x256xf32, #tpu.memory_space<vmem>>, vector<8x256xf32>
    %c0_1 = arith.constant 0 : index
    %c0_2 = arith.constant 0 : index
    %1 = vector.load %arg3[%c0_1, %c0_2] : memref<256x256xf32, #tpu.memory_space<vmem>>, vector<256x256xf32>
    %cst = arith.constant dense<0.000000e+00> : vector<8x256xf32>
    %2 = tpu.matmul %0, %1, %cst {dimension_numbers = #tpu.dot_dimension_numbers<[1], [0], [0], [1], [0, 0, 1, 1], [], []>, precision = #tpu.contract_precision<fp32>} : vector<8x256xf32>, vector<256x256xf32>, vector<8x256xf32> -> vector<8x256xf32>
    %c0_3 = arith.constant 0 : index
    %c0_4 = arith.constant 0 : index
    %3 = vector.load %arg4[%c0_3, %c0_4] : memref<8x256xf32, #tpu.memory_space<vmem>>, vector<8x256xf32>
    tpu.vector_store %arg4[%c0_3, %c0_4], %2 {strides = array<i32>} : memref<8x256xf32, #tpu.memory_space<vmem>>, vector<8x256xf32>,
    return
  }
  func.func @transform_0(%arg0: i32, %arg1: i32) -> (i32, i32) {
    %c0_i32 = arith.constant 0 : i32
    %c0_i32_0 = arith.constant 0 : i32
    return %arg0, %c0_i32 : i32, i32
  }
  func.func @transform_1(%arg0: i32, %arg1: i32) -> (i32, i32) {
    %c0_i32 = arith.constant 0 : i32
    %c0_i32_0 = arith.constant 0 : i32
    return %c0_i32, %arg1 : i32, i32
  }
  func.func @transform_2(%arg0: i32, %arg1: i32) -> (i32, i32) {
    %c0_i32 = arith.constant 0 : i32
    return %arg0, %arg1 : i32, i32
  }
}

</mosaic_0001>

<bundles_post_ra>
// kernel: lpf_forward.1
= control target key start
LH: loop header
LB: loop body
LE: loop exit
PB: predicated region body
PF: predicated region fallthrough
CT: control target
= control target key end

     0   :  { %7 = vsyncpa [#allocation3], 0  ;;  %s1493_s12 = smov [#allocation2]   ;;  %s1494_s14 = smov 256   ;;  %s2534_s0 = inlined_call_operand.vmem [shape: f32[8,256], index: 0, kind: input, shape index: {}]   ;;  %s2535_s1 = inlined_call_operand.hbm [shape: f32[256,256], index: 1, kind: input, shape index: {}]   ;;  %s2536_s2 = inlined_call_operand.vmem [shape: f32[8,256], index: 2, kind: output, shape index: {}]  }
   0x1   :  { %s14_s11 = sshll.u32 %s2535_s1, 4  ;;  %s16_s13 = sshll.u32 %s1493_s12, 4  ;;  %s15_s11 = int_to_ptr.hbm [resolvable:$true] %s14_s11  ;;  %s17_s13 = int_to_ptr.vmem [resolvable:$true] %s16_s13 }
   0x2   :  { %s1495_s15 = smov 16  }
   0x3   :  { %22 = dma.hbm_to_vmem [thread:$0]  %s15_s11, 8192, %s17_s13, [#allocation3], %s1494_s14, %s1494_s14, %s1495_s15  }
   0x4   :  { %1491 = dma.done.wait [#allocation3], 8192  }
   0x5   :  { %1492 = vsyncadd [#allocation3], 4294959104  ;;  %v59_v0 = vld [vmem:[#allocation2 + $0xf0] sm:$0xff]  ;;  %v57_v1 = vld [vmem:[#allocation2 + $0xe0] sm:$0xff] }
   0x6   :  { %v55_v2 = vld [vmem:[#allocation2 + $0xd0] sm:$0xff]  ;;  %v1514_v3 = vand.u32 4294901760, %v59_v0  ;;  %v1516_v4 = vand.u32 4294901760, %v57_v1  ;;  %v53_v6 = vld [vmem:[#allocation2 + $0xc0] sm:$0xff] }
   0x7   :  { %v1518_v5 = vand.u32 4294901760, %v55_v2  ;;  %v51_v7 = vld [vmem:[#allocation2 + $0xb0] sm:$0xff]  ;;  %v49_v8 = vld [vmem:[#allocation2 + $0xa0] sm:$0xff]  ;;  %v1520_v9 = vand.u32 4294901760, %v53_v6 }
   0x8   :  { %v1522_v10 = vand.u32 4294901760, %v51_v7  ;;  %v1524_v11 = vand.u32 4294901760, %v49_v8  ;;  %v47_v12 = vld [vmem:[#allocation2 + $0x90] sm:$0xff]  ;;  %v45_v13 = vld [vmem:[#allocation2 + $0x80] sm:$0xff]  ;;  %94 = vmatpush.msra.mxu0 %v1514_v3  ;;  %v1528_v14 = vsub.f32 %v59_v0, %v1514_v3  ;;  %v1531_v15 = vsub.f32 %v57_v1, %v1516_v4  ;;  %290 = vmatpush.msra.mxu3 %v1514_v3 }
   0x9   :  { %v1535_v16 = vsub.f32 %v55_v2, %v1518_v5  ;;  %v1537_v17 = vand.u32 4294901760, %v47_v12  ;;  %v43_v18 = vld [vmem:[#allocation2 + $0x70] sm:$0xff]  ;;  %v1540_v19 = vsub.f32 %v53_v6, %v1520_v9  ;;  %v1553_v25 = vand.u32 4294901760, %v45_v13  ;;  %v41_v26 = vld [vmem:[#allocation2 + $0x60] sm:$0xff] }
   0xa   :  { %v1543_v20 = vsub.f32 %v51_v7, %v1522_v10  ;;  %v1546_v21 = vsub.f32 %v49_v8, %v1524_v11  ;;  %96 = vmatpush.msra.mxu0 %v1516_v4  ;;  %237 = vmatpush.msra.mxu2 %v1528_v14  ;;  %v136_v22 = vand.u32 4294901760, %v1528_v14  ;;  %v2552_v23 = vand.u32 4294901760, %v1531_v15  ;;  %v39_v34 = vld [vmem:[#allocation2 + $0x50] sm:$0xff]  ;;  %v37_v42 = vld [vmem:[#allocation2 + $0x40] sm:$0xff] }
   0xb   :  { %v2550_v24 = vand.u32 4294901760, %v1535_v16  ;;  %292 = vmatpush.msra.mxu3 %v1516_v4  ;;  %v2548_v27 = vand.u32 4294901760, %v1540_v19  ;;  %v1557_v28 = vand.u32 4294901760, %v43_v18  ;;  %v1560_v29 = vsub.f32 %v47_v12, %v1537_v17  ;;  %v35_v48 = vld [vmem:[#allocation2 + $0x30] sm:$0xff]  ;;  %v33_v54 = vld [vmem:[#allocation2 + $0x20] sm:$0xff] }
   0xc   :  { %98 = vmatpush.msra.mxu0 %v1518_v5  ;;  %240 = vmatpush.msra.mxu2 %v1531_v15  ;;  %v137_v30 = vsub.f32 %v1528_v14, %v136_v22  ;;  %v143_v31 = vsub.f32 %v1531_v15, %v2552_v23  ;;  %v2546_v33 = vand.u32 4294901760, %v1543_v20  ;;  %v1575_v35 = vand.u32 4294901760, %v41_v26  ;;  %v91_v59 = vld [vmem:[#allocation2 + $0x1f0] sm:$0xff]  ;;  %v29_v2 = vld [vmem:[#allocation2] sm:$0xff] }
   0xd   :  { %v149_v32 = vsub.f32 %v1535_v16, %v2550_v24  ;;  %294 = vmatpush.msra.mxu3 %v1518_v5  ;;  %v2544_v36 = vand.u32 4294901760, %v1546_v21  ;;  %v155_v39 = vsub.f32 %v1540_v19, %v2548_v27  ;;  %v1584_v40 = vsub.f32 %v45_v13, %v1553_v25  ;;  %v31_v61 = vld [vmem:[#allocation2 + $0x10] sm:$0xff]  ;;  %v89_v6 = vld [vmem:[#allocation2 + $0x1e0] sm:$0xff] }
   0xe   :  { %100 = vmatpush.msra.mxu0 %v1520_v9  ;;  %v138_v37 = vand.u32 4294901760, %v137_v30  ;;  %243 = vmatpush.msra.mxu2 %v1535_v16  ;;  %v144_v38 = vand.u32 4294901760, %v143_v31  ;;  %v1587_v41 = vand.u32 4294901760, %v39_v34  ;;  %v161_v44 = vsub.f32 %v1543_v20, %v2546_v33 }
   0xf   :  { %296 = vmatpush.msra.mxu3 %v1520_v9  ;;  %v150_v43 = vand.u32 4294901760, %v149_v32  ;;  %v2543_v45 = vand.u32 4294901760, %v1560_v29  ;;  %v1595_v46 = vsub.f32 %v43_v18, %v1557_v28  ;;  %v167_v47 = vsub.f32 %v1546_v21, %v2544_v36  ;;  %v87_v32 = vld [vmem:[#allocation2 + $0x1d0] sm:$0xff] }
  0x10   :  { %102 = vmatpush.msra.mxu0 %v1522_v10  ;;  %139 = vmatpush.msra.mxu1 %v138_v37  ;;  %v156_v49 = vand.u32 4294901760, %v155_v39  ;;  %v1603_v50 = vand.u32 4294901760, %v37_v42  ;;  %v2542_v51 = vand.u32 4294901760, %v1584_v40  ;;  %v1607_v52 = vsub.f32 %v41_v26, %v1575_v35 }
  0x11   :  { %246 = vmatpush.msra.mxu2 %v1540_v19  ;;  %298 = vmatpush.msra.mxu3 %v1522_v10  ;;  %v1612_v53 = vsub.f32 %v39_v34, %v1587_v41  ;;  %v162_v55 = vand.u32 4294901760, %v161_v44  ;;  %v173_v56 = vsub.f32 %v1560_v29, %v2543_v45  ;;  %v1618_v57 = vand.u32 4294901760, %v35_v48  ;;  %v85_v44 = vld [vmem:[#allocation2 + $0x1c0] sm:$0xff] }
  0x12   :  { %104 = vmatpush.msra.mxu0 %v1524_v11  ;;  %145 = vmatpush.msra.mxu1 %v144_v38  ;;  %v2541_v58 = vand.u32 4294901760, %v1595_v46  ;;  %v168_v60 = vand.u32 4294901760, %v167_v47  ;;  %v179_v62 = vsub.f32 %v1584_v40, %v2542_v51  ;;  %v1627_v63 = vand.u32 4294901760, %v33_v54  ;;  %v77_v45 = vld [vmem:[#allocation2 + $0x180] sm:$0xff] }
  0x13   :  { %249 = vmatpush.msra.mxu2 %v1543_v20  ;;  %300 = vmatpush.msra.mxu3 %v1524_v11  ;;  %v2539_v0 = vand.u32 4294901760, %v1607_v52  ;;  %v1631_v1 = vsub.f32 %v37_v42, %v1603_v50  ;;  %v2538_v7 = vand.u32 4294901760, %v1612_v53  ;;  %v1636_v8 = vand.u32 4294901760, %v91_v59 }
  0x14   :  { %106 = vmatpush.msra.mxu0 %v1537_v17  ;;  %151 = vmatpush.msra.mxu1 %v150_v43  ;;  %v174_v12 = vand.u32 4294901760, %v173_v56  ;;  %v185_v13 = vsub.f32 %v1595_v46, %v2541_v58  ;;  %v1642_v18 = vand.u32 4294901760, %v31_v61  ;;  %v1645_v26 = vsub.f32 %v35_v48, %v1618_v57 }
  0x15   :  { %252 = vmatpush.msra.mxu2 %v1546_v21  ;;  %302 = vmatpush.msra.mxu3 %v1537_v17  ;;  %v1649_v30 = vand.u32 4294901760, %v29_v2  ;;  %v1651_v31 = vand.u32 4294901760, %v89_v6  ;;  %v180_v34 = vand.u32 4294901760, %v179_v62  ;;  %v191_v37 = vsub.f32 %v1607_v52, %v2539_v0 }
  0x16   :  { %108 = vmatpush.msra.mxu0 %v1553_v25  ;;  %157 = vmatpush.msra.mxu1 %v156_v49  ;;  %v2537_v38 = vand.u32 4294901760, %v1631_v1  ;;  %v1659_v39 = vsub.f32 %v33_v54, %v1627_v63  ;;  %v197_v42 = vsub.f32 %v1612_v53, %v2538_v7  ;;  %v1667_v43 = vsub.f32 %v91_v59, %v1636_v8  ;;  %v83_v59 = vld [vmem:[#allocation2 + $0x1b0] sm:$0xff] }
  0x17   :  { %255 = vmatpush.msra.mxu2 %v1560_v29  ;;  %304 = vmatpush.msra.mxu3 %v1553_v25  ;;  %2586 = vst [vmem:[#allocation5_spill] sm:$0xff] %v1649_v30  ;;  %v186_v47 = vand.u32 4294901760, %v185_v13  ;;  %v2540_v48 = vand.u32 4294901760, %v1645_v26  ;;  %v1672_v49 = vsub.f32 %v31_v61, %v1642_v18  ;;  %v1674_v54 = vand.u32 4294901760, %v87_v32  ;;  %v81_v13 = vld [vmem:[#allocation2 + $0x1a0] sm:$0xff] }
  0x18   :  { %110 = vmatpush.msra.mxu0 %v1557_v28  ;;  %163 = vmatpush.msra.mxu1 %v162_v55  ;;  %v1679_v55 = vsub.f32 %v29_v2, %v1649_v30  ;;  %v1682_v56 = vsub.f32 %v89_v6, %v1651_v31  ;;  %v203_v61 = vsub.f32 %v1631_v1, %v2537_v38  ;;  %v2545_v62 = vand.u32 4294901760, %v1659_v39 }
  0x19   :  { %258 = vmatpush.msra.mxu2 %v1584_v40  ;;  %306 = vmatpush.msra.mxu3 %v1557_v28  ;;  %v198_v2 = vand.u32 4294901760, %v197_v42  ;;  %v2547_v6 = vand.u32 4294901760, %v1667_v43  ;;  %v1700_v38 = vsub.f32 %v87_v32, %v1674_v54  ;;  %v1702_v7 = vand.u32 4294901760, %v83_v59  ;;  %v79_v42 = vld [vmem:[#allocation2 + $0x190] sm:$0xff] }
  0x1a   :  { %112 = vmatpush.msra.mxu0 %v1575_v35  ;;  %169 = vmatpush.msra.mxu1 %v168_v60  ;;  %v192_v60 = vand.u32 4294901760, %v191_v37  ;;  %v2549_v37 = vand.u32 4294901760, %v1672_v49  ;;  %v2553_v0 = vand.u32 4294901760, %v1679_v55  ;;  %v215_v32 = vsub.f32 %v1659_v39, %v2545_v62 }
  0x1b   :  { %261 = vmatpush.msra.mxu2 %v1595_v46  ;;  %308 = vmatpush.msra.mxu3 %v1575_v35  ;;  %v1715_v51 = vand.u32 4294901760, %v81_v13  ;;  %v478_v36 = vsub.f32 %v1667_v43, %v2547_v6  ;;  %v2554_v62 = vand.u32 4294901760, %v1700_v38  ;;  %v1730_v33 = vsub.f32 %v83_v59, %v1702_v7 }
  0x1c   :  { %114 = vmatpush.msra.mxu0 %v1587_v41  ;;  %175 = vmatpush.msra.mxu1 %v174_v12  ;;  %v1689_v12 = vand.u32 4294901760, %v85_v44  ;;  %v1737_v27 = vand.u32 4294901760, %v77_v45  ;;  %v227_v59 = vsub.f32 %v1679_v55, %v2553_v0  ;;  %v2587_v14 = vand.u32 4294901760, %v1531_v15 }
  0x1d   :  { %264 = vmatpush.msra.mxu2 %v1607_v52  ;;  %310 = vmatpush.msra.mxu3 %v1587_v41  ;;  %v1745_v24 = vsub.f32 %v81_v13, %v1715_v51  ;;  %v490_v0 = vsub.f32 %v1700_v38, %v2554_v62  ;;  %v2589_v15 = vand.u32 4294901760, %v1535_v16  ;;  %v2591_v16 = vand.u32 4294901760, %v1540_v19 }
  0x1e   :  { %116 = vmatpush.msra.mxu0 %v1603_v50  ;;  %181 = vmatpush.msra.mxu1 %v180_v34  ;;  %v209_v34 = vsub.f32 %v1645_v26, %v2540_v48  ;;  %v204_v48 = vand.u32 4294901760, %v203_v61  ;;  %v1713_v58 = vsub.f32 %v85_v44, %v1689_v12  ;;  %v221_v44 = vsub.f32 %v1672_v49, %v2549_v37 }
  0x1f   :  { %267 = vmatpush.msra.mxu2 %v1612_v53  ;;  %312 = vmatpush.msra.mxu3 %v1603_v50  ;;  %v2593_v19 = vand.u32 4294901760, %v1543_v20 }
  0x20   :  { %118 = vmatpush.msra.mxu0 %v1618_v57  ;;  %187 = vmatpush.msra.mxu1 %v186_v47  ;;  %v2551_v47 = vand.u32 4294901760, %v1682_v56  ;;  %v210_v61 = vand.u32 4294901760, %v209_v34  ;;  %v216_v34 = vand.u32 4294901760, %v215_v32  ;;  %v222_v32 = vand.u32 4294901760, %v221_v44 }
  0x21   :  { %270 = vmatpush.msra.mxu2 %v1631_v1  ;;  %314 = vmatpush.msra.mxu3 %v1618_v57  ;;  %v2588_v44 = vand.u32 4294901760, %v1713_v58 }
  0x22   :  { %120 = vmatpush.msra.mxu0 %v1627_v63  ;;  %193 = vmatpush.msra.mxu1 %v192_v60  ;;  %v1722_v60 = vand.u32 4294901760, %v79_v42  ;;  %v484_v6 = vsub.f32 %v1682_v56, %v2551_v47  ;;  %v479_v47 = vand.u32 4294901760, %v478_v36  ;;  %v1764_v36 = vsub.f32 %v77_v45, %v1737_v27 }
  0x23   :  { %273 = vmatpush.msra.mxu2 %v1645_v26  ;;  %316 = vmatpush.msra.mxu3 %v1627_v63  ;;  %v496_v62 = vsub.f32 %v1713_v58, %v2588_v44 }
  0x24   :  { %122 = vmatpush.msra.mxu0 %v1642_v18  ;;  %199 = vmatpush.msra.mxu1 %v198_v2  ;;  %v75_v2 = vld [vmem:[#allocation2 + $0x170] sm:$0xff]  ;;  %v1751_v23 = vsub.f32 %v79_v42, %v1722_v60 }
  0x25   :  { %276 = vmatpush.msra.mxu2 %v1659_v39  ;;  %318 = vmatpush.msra.mxu3 %v1642_v18  ;;  %v1758_v37 = vand.u32 4294901760, %v75_v2  ;;  %v71_v42 = vld [vmem:[#allocation2 + $0x150] sm:$0xff] }
  0x26   :  { %124 = vmatpush.msra.mxu0 %v1649_v30  ;;  %205 = vmatpush.msra.mxu1 %v204_v48  ;;  %v73_v48 = vld [vmem:[#allocation2 + $0x160] sm:$0xff]  ;;  %v1783_v13 = vand.u32 4294901760, %v71_v42 }
  0x27   :  { %279 = vmatpush.msra.mxu2 %v1672_v49  ;;  %320 = vmatpush.msra.mxu3 %v1649_v30  ;;  %v1771_v30 = vand.u32 4294901760, %v73_v48  ;;  %v1781_v44 = vsub.f32 %v75_v2, %v1758_v37 }
  0x28   :  { %331 = vmatpush.msrb.mxu0 %v136_v22  ;;  %211 = vmatpush.msra.mxu1 %v210_v61  ;;  %v485_v22 = vand.u32 4294901760, %v484_v6  ;;  %v228_v61 = vand.u32 4294901760, %v227_v59  ;;  %v69_v6 = vld [vmem:[#allocation2 + $0x140] sm:$0xff]  ;;  %v2590_v59 = vand.u32 4294901760, %v1730_v33 }
  0x29   :  { %282 = vmatpush.msra.mxu2 %v1679_v55  ;;  %480 = vmatpush.msrb.mxu3 %v479_v47  ;;  %v2556_v47 = vand.u32 4294901760, %v1764_v36  ;;  %v1793_v2 = vsub.f32 %v73_v48, %v1771_v30  ;;  %v1795_v45 = vand.u32 4294901760, %v69_v6 }
  0x2a   :  { %335 = vmatpush.msrb.mxu0 %v2587_v14  ;;  %217 = vmatpush.msra.mxu1 %v216_v34  ;;  %v491_v34 = vand.u32 4294901760, %v490_v0  ;;  %v502_v14 = vsub.f32 %v1730_v33, %v2590_v59  ;;  %v497_v0 = vand.u32 4294901760, %v496_v62  ;;  %v27_v62 = vld [vmem:[%s2534_s0] sm:$0xff] }
  0x2b   :  { %435 = vmatpush.msrb.mxu2 %v1636_v8  ;;  %486 = vmatpush.msrb.mxu3 %v485_v22  ;;  %v2594_v22 = vand.u32 4294901760, %v1751_v23 }
  0x2c   :  { %339 = vmatpush.msrb.mxu0 %v2589_v15  ;;  %223 = vmatpush.msra.mxu1 %v222_v32  ;;  %v67_v15 = vld [vmem:[#allocation2 + $0x130] sm:$0xff]  ;;  %v2592_v32 = vand.u32 4294901760, %v1745_v24  ;;  %v503_v48 = vand.u32 4294901760, %v502_v14 }
  0x2d   :  { %437 = vmatpush.msrb.mxu2 %v1651_v31  ;;  %492 = vmatpush.msrb.mxu3 %v491_v34  ;;  %v1811_v20 = vand.u32 4294901760, %v67_v15 }
  0x2e   :  { %343 = vmatpush.msrb.mxu0 %v2591_v16  ;;  %229 = vmatpush.msra.mxu1 %v228_v61  ;;  %v508_v59 = vsub.f32 %v1745_v24, %v2592_v32  ;;  %v514_v61 = vsub.f32 %v1751_v23, %v2594_v22  ;;  %v1809_v32 = vsub.f32 %v71_v42, %v1783_v13  ;;  %v65_v22 = vld [vmem:[#allocation2 + $0x120] sm:$0xff]  ;;  %v1824_v16 = vand.u32 4294901760, %v27_v62 }
  0x2f   :  { %439 = vmatpush.msrb.mxu2 %v1674_v54  ;;  %498 = vmatpush.msrb.mxu3 %v497_v0  ;;  %v1822_v42 = vsub.f32 %v69_v6, %v1795_v45  ;;  %v2598_v0 = vand.u32 4294901760, %v1781_v44  ;;  %v1834_v6 = vand.u32 4294901760, %v65_v22  ;;  %v1837_v14 = vsub.f32 %v67_v15, %v1811_v20 }
  0x30   :  { %347 = vmatpush.msrb.mxu0 %v2593_v19  ;;  %398 = vmatpush.msrb.mxu1 %v1514_v3  ;;  %v2595_v3 = vand.u32 4294901760, %v1546_v21  ;;  %v520_v19 = vsub.f32 %v1764_v36, %v2556_v47  ;;  %v509_v34 = vand.u32 4294901760, %v508_v59  ;;  %2596 = vst [vmem:[#allocation6_spill] sm:$0xff] %v1824_v16  ;;  %v2597_v21 = vand.u32 4294901760, %v1560_v29  ;;  %v61_v47 = vld [vmem:[#allocation2 + $0x100] sm:$0xff] }
  0x31   :  { %441 = vmatpush.msrb.mxu2 %v1689_v12  ;;  %504 = vmatpush.msrb.mxu3 %v503_v48  ;;  %v526_v59 = vsub.f32 %v1781_v44, %v2598_v0  ;;  %v2599_v29 = vand.u32 4294901760, %v1584_v40  ;;  %v1848_v0 = vsub.f32 %v27_v62, %v1824_v16  ;;  %v2601_v40 = vand.u32 4294901760, %v1595_v46 }
  0x32   :  { %351 = vmatpush.msrb.mxu0 %v2595_v3  ;;  %400 = vmatpush.msrb.mxu1 %v1516_v4  ;;  %v515_v4 = vand.u32 4294901760, %v514_v61  ;;  %v63_v3 = vld [vmem:[#allocation2 + $0x110] sm:$0xff]  ;;  %v2600_v61 = vand.u32 4294901760, %v1793_v2  ;;  %v1861_v62 = vsub.f32 %v65_v22, %v1834_v6  ;;  %v1866_v46 = vand.u32 4294901760, %v61_v47 }
  0x33   :  { %443 = vmatpush.msrb.mxu2 %v1702_v7  ;;  %510 = vmatpush.msrb.mxu3 %v509_v34  ;;  %v1850_v15 = vand.u32 4294901760, %v63_v3 }
  0x34   :  { %355 = vmatpush.msrb.mxu0 %v2597_v21  ;;  %402 = vmatpush.msrb.mxu1 %v1518_v5  ;;  %v521_v5 = vand.u32 4294901760, %v520_v19  ;;  %v532_v48 = vsub.f32 %v1793_v2, %v2600_v61  ;;  %v543_v21 = vand.u32 4294901760, %v1822_v42  ;;  %v2602_v19 = vand.u32 4294901760, %v1809_v32 }
  0x35   :  { %445 = vmatpush.msrb.mxu2 %v1715_v51  ;;  %516 = vmatpush.msrb.mxu3 %v515_v4  ;;  %v2603_v61 = vand.u32 4294901760, %v1607_v52  ;;  %v1876_v22 = vsub.f32 %v63_v3, %v1850_v15  ;;  %v2605_v52 = vand.u32 4294901760, %v1612_v53  ;;  %v555_v3 = vand.u32 4294901760, %v1861_v62 }
  0x36   :  { %359 = vmatpush.msrb.mxu0 %v2599_v29  ;;  %404 = vmatpush.msrb.mxu1 %v1520_v9  ;;  %v527_v9 = vand.u32 4294901760, %v526_v59  ;;  %v538_v34 = vsub.f32 %v1809_v32, %v2602_v19  ;;  %v549_v29 = vand.u32 4294901760, %v1837_v14  ;;  %v544_v4 = vsub.f32 %v1822_v42, %v543_v21 }
  0x37   :  { %447 = vmatpush.msrb.mxu2 %v1722_v60  ;;  %522 = vmatpush.msrb.mxu3 %v521_v5  ;;  %v1873_v59 = vand.u32 4294901760, %v1848_v0  ;;  %v561_v19 = vand.u32 4294901760, %v1876_v22 }
  0x38   :  { %363 = vmatpush.msrb.mxu0 %v2601_v40  ;;  %406 = vmatpush.msrb.mxu1 %v1522_v10  ;;  %v533_v10 = vand.u32 4294901760, %v532_v48  ;;  %v539_v5 = vand.u32 4294901760, %v538_v34  ;;  %v550_v48 = vsub.f32 %v1837_v14, %v549_v29  ;;  %v2606_v40 = vand.u32 4294901760, %v1631_v1 }
  0x39   :  { %449 = vmatpush.msrb.mxu2 %v1737_v27  ;;  %2604 = vst [vmem:[#allocation7_spill] sm:$0xff] %v1873_v59  ;;  %528 = vmatpush.msrb.mxu3 %v527_v9  ;;  %v545_v53 = vand.u32 4294901760, %v544_v4  ;;  %v128_v9 = vsub.f32 %v1848_v0, %v1873_v59  ;;  %v556_v1 = vsub.f32 %v1861_v62, %v555_v3 }
  0x3a   :  { %367 = vmatpush.msrb.mxu0 %v2603_v61  ;;  %408 = vmatpush.msrb.mxu1 %v1524_v11  ;;  %v28_v11 = vld [vmem:[%s2534_s0 + $0x8] sm:$0xff]  ;;  %v2608_v61 = vand.u32 4294901760, %v1645_v26 }
  0x3b   :  { %451 = vmatpush.msrb.mxu2 %v1758_v37  ;;  %534 = vmatpush.msrb.mxu3 %v533_v10  ;;  %v1899_v34 = vand.u32 4294901760, %v28_v11  ;;  %v1913_v26 = vand.u32 4294901760, %v128_v9 }
  0x3c   :  { %371 = vmatpush.msrb.mxu0 %v2605_v52  ;;  %410 = vmatpush.msrb.mxu1 %v1537_v17  ;;  %v1893_v17 = vsub.f32 %v61_v47, %v1866_v46  ;;  %v2609_v47 = vand.u32 4294901760, %v1659_v39  ;;  %v2611_v52 = vand.u32 4294901760, %v1672_v49  ;;  %v2612_v39 = vand.u32 4294901760, %v1679_v55 }
  0x3d   :  { %453 = vmatpush.msrb.mxu2 %v1771_v30  ;;  %2607 = vst [vmem:[#allocation8_spill] sm:$0xff] %v1899_v34  ;;  %540 = vmatpush.msrb.mxu3 %v539_v5  ;;  %v1919_v4 = vsub.f32 %v28_v11, %v1899_v34 }
  0x3e   :  { %375 = vmatpush.msrb.mxu0 %v2606_v40  ;;  %412 = vmatpush.msrb.mxu1 %v1553_v25  ;;  %v551_v25 = vand.u32 4294901760, %v550_v48  ;;  %v567_v10 = vand.u32 4294901760, %v1893_v17  ;;  %v2617_v48 = vld [vmem:[#allocation5_spill] sm:$0xff] }
  0x3f   :  { %455 = vmatpush.msrb.mxu2 %v1783_v13  ;;  %546 = vmatpush.msrb.mxu3 %v545_v53  ;;  %2610 = vst [vmem:[#allocation9_spill] sm:$0xff] %v1919_v4  ;;  %v44_v53 = vld [vmem:[#allocation2 + $0x78] sm:$0xff] }
  0x40   :  { %379 = vmatpush.msrb.mxu0 %v2608_v61  ;;  %414 = vmatpush.msrb.mxu1 %v1557_v28  ;;  %v562_v28 = vsub.f32 %v1876_v22, %v561_v19  ;;  %v568_v5 = vsub.f32 %v1893_v17, %v567_v10  ;;  %v42_v61 = vld [vmem:[#allocation2 + $0x68] sm:$0xff] }
  0x41   :  { %457 = vmatpush.msrb.mxu2 %v1795_v45  ;;  %552 = vmatpush.msrb.mxu3 %v551_v25  ;;  %v2081_v25 = vand.u32 4294901760, %v44_v53 }
  0x42   :  { %383 = vmatpush.msrb.mxu0 %v2609_v47  ;;  %416 = vmatpush.msrb.mxu1 %v1575_v35  ;;  %v557_v35 = vand.u32 4294901760, %v556_v1  ;;  %v563_v49 = vand.u32 4294901760, %v562_v28 }
  0x43   :  { %459 = vmatpush.msrb.mxu2 %v1811_v20  ;;  %130 = vmatmul.f32.vlgmr.msra.gmra.mxu0 %v1913_v26 }
  0x44   :  { %387 = vmatpush.msrb.mxu0 %v2611_v52  ;;  %418 = vmatpush.msrb.mxu1 %v1587_v41  ;;  %v1934_v41 = vand.u32 4294901760, %v1919_v4  ;;  %v40_v52 = vld [vmem:[#allocation2 + $0x58] sm:$0xff] }
  0x45   :  { %461 = vmatpush.msrb.mxu2 %v1834_v6  ;;  %558 = vmatpush.msrb.mxu3 %v557_v35 }
  0x46   :  { %391 = vmatpush.msrb.mxu0 %v2612_v39  ;;  %420 = vmatpush.msrb.mxu1 %v1603_v50  ;;  %2613 = vst [vmem:[#allocation10_spill] sm:$0xff] %v1934_v41  ;;  %v569_v50 = vand.u32 4294901760, %v568_v5  ;;  %v469_v55 = vsub.f32 %v1919_v4, %v1934_v41 }
  0x47   :  { %463 = vmatpush.msrb.mxu2 %v1850_v15  ;;  %564 = vmatpush.msrb.mxu3 %v563_v49 }
  0x48   :  { %578 = vmatpush.msra.mxu0 %v1667_v43  ;;  %422 = vmatpush.msrb.mxu1 %v1618_v57  ;;  %v2614_v57 = vand.u32 4294901760, %v1667_v43  ;;  %v1953_v11 = vand.u32 4294901760, %v469_v55  ;;  %v2619_v43 = vand.u32 4294901760, %v1713_v58 }
  0x49   :  { %285 = vmatmul.f32.vlgmr.msra.gmra.mxu2 %v1848_v0  ;;  %324 = vmatmul.f32.vlgmr.msra.gmra.mxu3 %v1873_v59 }
  0x4a   :  { %581 = vmatpush.msra.mxu0 %v1682_v56  ;;  %424 = vmatpush.msrb.mxu1 %v1627_v63  ;;  %v2615_v63 = vand.u32 4294901760, %v1682_v56  ;;  %2616 = vst [vmem:[#allocation11_spill] sm:$0xff] %v1953_v11  ;;  %v2626_v56 = vand.u32 4294901760, %v1809_v32 }
  0x4b   :  { %465 = vmatpush.msrb.mxu2 %v1866_v46  ;;  %570 = vmatpush.msrb.mxu3 %v569_v50  ;;  %v2108_v50 = vsub.f32 %v44_v53, %v2081_v25  ;;  %v92_v53 = vld [vmem:[#allocation2 + $0x1f8] sm:$0xff] }
  0x4c   :  { %584 = vmatpush.msra.mxu0 %v1700_v38  ;;  %426 = vmatpush.msrb.mxu1 %v1642_v18  ;;  %v2618_v18 = vand.u32 4294901760, %v1700_v38 }
  0x4d   :  { %672 = vmatpush.msra.mxu2 %v2614_v57  ;;  %231 = vmatmul.f32.vlgmr.msra.gmra.mxu1 %v1824_v16 }
  0x4e   :  { %587 = vmatpush.msra.mxu0 %v1713_v58  ;;  %739 = vmatpush.msra.mxu3 %v1636_v8  ;;  %v2621_v58 = vand.u32 4294901760, %v1745_v24 }
  0x4f   :  { %676 = vmatpush.msra.mxu2 %v2615_v63  ;;  %428 = vmatpush.msrb.mxu1 %v2617_v48  ;;  %v2114_v63 = vand.u32 4294901760, %v40_v52 }
  0x50   :  { %590 = vmatpush.msra.mxu0 %v1730_v33  ;;  %741 = vmatpush.msra.mxu3 %v1651_v31 }
  0x51   :  { %631 = vmatpush.msra.mxu1 %v1636_v8  ;;  %680 = vmatpush.msra.mxu2 %v2618_v18  ;;  %v2620_v8 = vand.u32 4294901760, %v1730_v33  ;;  %v2622_v33 = vand.u32 4294901760, %v1751_v23 }
  0x52   :  { %471 = vmatmul.f32.vlgmr.msrb.gmra.mxu2 %v1953_v11  ;;  %593 = vmatpush.msra.mxu0 %v1745_v24  ;;  %v60_v24 = vld [vmem:[#allocation2 + $0xf8] sm:$0xff] }
  0x53   :  { %633 = vmatpush.msra.mxu1 %v1651_v31  ;;  %684 = vmatpush.msra.mxu2 %v2619_v43  ;;  %v2623_v31 = vand.u32 4294901760, %v1764_v36  ;;  %v2001_v38 = vand.u32 4294901760, %v60_v24  ;;  %v36_v43 = vld [vmem:[#allocation2 + $0x38] sm:$0xff] }
  0x54   :  { %743 = vmatpush.msra.mxu3 %v1674_v54  ;;  %393 = vmatmul.f32.vlgmr.msrb.gmra.mxu0 %v1824_v16 }
  0x55   :  { %572 = vmatmul.f32.vlgmr.msrb.gmra.mxu3 %v1899_v34  ;;  %596 = vmatpush.msra.mxu0 %v1751_v23  ;;  %v58_v23 = vld [vmem:[#allocation2 + $0xe8] sm:$0xff] }
  0x56   :  { %635 = vmatpush.msra.mxu1 %v1674_v54  ;;  %688 = vmatpush.msra.mxu2 %v2620_v8  ;;  %v56_v54 = vld [vmem:[#allocation2 + $0xd8] sm:$0xff] }
  0x57   :  { %745 = vmatpush.msra.mxu3 %v1689_v12  ;;  %430 = vmatmul.f32.vlgmr.msrb.gmra.mxu1 %v1824_v16 }
  0x58   :  { %599 = vmatpush.msra.mxu0 %v1764_v36  ;;  %637 = vmatpush.msra.mxu1 %v1689_v12  ;;  %v2008_v12 = vand.u32 4294901760, %v58_v23  ;;  %v52_v36 = vld [vmem:[#allocation2 + $0xb8] sm:$0xff] }
  0x59   :  { %692 = vmatpush.msra.mxu2 %v2621_v58  ;;  %747 = vmatpush.msra.mxu3 %v1702_v7 }
  0x5a   :  { %602 = vmatpush.msra.mxu0 %v1781_v44  ;;  %639 = vmatpush.msra.mxu1 %v1702_v7  ;;  %v2624_v7 = vand.u32 4294901760, %v1781_v44  ;;  %v2028_v44 = vsub.f32 %v58_v23, %v2008_v12 }
  0x5b   :  { %696 = vmatpush.msra.mxu2 %v2622_v33  ;;  %749 = vmatpush.msra.mxu3 %v1715_v51 }
  0x5c   :  { %605 = vmatpush.msra.mxu0 %v1793_v2  ;;  %641 = vmatpush.msra.mxu1 %v1715_v51  ;;  %v2625_v51 = vand.u32 4294901760, %v1793_v2  ;;  %v50_v2 = vld [vmem:[#allocation2 + $0xa8] sm:$0xff] }
  0x5d   :  { %700 = vmatpush.msra.mxu2 %v2623_v31  ;;  %751 = vmatpush.msra.mxu3 %v1722_v60 }
  0x5e   :  { %608 = vmatpush.msra.mxu0 %v1809_v32  ;;  %643 = vmatpush.msra.mxu1 %v1722_v60  ;;  %v2015_v60 = vand.u32 4294901760, %v56_v54 }
  0x5f   :  { %704 = vmatpush.msra.mxu2 %v2624_v7  ;;  %753 = vmatpush.msra.mxu3 %v1737_v27  ;;  %v34_v7 = vld [vmem:[#allocation2 + $0x28] sm:$0xff] }
  0x60   :  { %611 = vmatpush.msra.mxu0 %v1822_v42  ;;  %645 = vmatpush.msra.mxu1 %v1737_v27  ;;  %v54_v27 = vld [vmem:[#allocation2 + $0xc8] sm:$0xff]  ;;  %v48_v42 = vld [vmem:[#allocation2 + $0x98] sm:$0xff] }
  0x61   :  { %708 = vmatpush.msra.mxu2 %v2625_v51  ;;  %755 = vmatpush.msra.mxu3 %v1758_v37 }
  0x62   :  { %614 = vmatpush.msra.mxu0 %v1837_v14  ;;  %647 = vmatpush.msra.mxu1 %v1758_v37  ;;  %v2018_v37 = vsub.f32 %v60_v24, %v2001_v38  ;;  %v2039_v14 = vsub.f32 %v56_v54, %v2015_v60  ;;  %v2558_v24 = vand.u32 4294901760, %v2108_v50  ;;  %v2136_v54 = vand.u32 4294901760, %v36_v43 }
  0x63   :  { %712 = vmatpush.msra.mxu2 %v2626_v56  ;;  %757 = vmatpush.msra.mxu3 %v1771_v30  ;;  %v2139_v56 = vsub.f32 %v40_v52, %v2114_v63 }
  0x64   :  { %617 = vmatpush.msra.mxu0 %v1861_v62  ;;  %649 = vmatpush.msra.mxu1 %v1771_v30  ;;  %v2025_v30 = vand.u32 4294901760, %v54_v27  ;;  %v2570_v32 = vand.u32 4294901760, %v2018_v37  ;;  %v46_v62 = vld [vmem:[#allocation2 + $0x88] sm:$0xff] }
  0x65   :  { %716 = vmatpush.msra.mxu2 %v543_v21  ;;  %759 = vmatpush.msra.mxu3 %v1783_v13  ;;  %v2568_v21 = vand.u32 4294901760, %v2028_v44  ;;  %v2559_v52 = vand.u32 4294901760, %v2139_v56 }
  0x66   :  { %620 = vmatpush.msra.mxu0 %v1876_v22  ;;  %651 = vmatpush.msra.mxu1 %v1783_v13  ;;  %v2035_v13 = vand.u32 4294901760, %v52_v36  ;;  %v2060_v22 = vand.u32 4294901760, %v48_v42 }
  0x67   :  { %720 = vmatpush.msra.mxu2 %v549_v29  ;;  %761 = vmatpush.msra.mxu3 %v1795_v45  ;;  %v2050_v29 = vsub.f32 %v54_v27, %v2025_v30 }
  0x68   :  { %623 = vmatpush.msra.mxu0 %v1893_v17  ;;  %653 = vmatpush.msra.mxu1 %v1795_v45  ;;  %v2046_v45 = vand.u32 4294901760, %v50_v2  ;;  %v2064_v40 = vsub.f32 %v52_v36, %v2035_v13  ;;  %v2073_v17 = vand.u32 4294901760, %v46_v62  ;;  %v2090_v28 = vsub.f32 %v48_v42, %v2060_v22  ;;  %v32_v36 = vld [vmem:[#allocation2 + $0x18] sm:$0xff] }
  0x69   :  { %724 = vmatpush.msra.mxu2 %v555_v3  ;;  %763 = vmatpush.msra.mxu3 %v1811_v20  ;;  %v2567_v3 = vand.u32 4294901760, %v2039_v14  ;;  %v2565_v9 = vand.u32 4294901760, %v2050_v29 }
  0x6a   :  { %626 = vmatmul.f32.vlgmr.msra.gmra.mxu0 %v1919_v4  ;;  %655 = vmatpush.msra.mxu1 %v1811_v20  ;;  %v819_v20 = vsub.f32 %v2018_v37, %v2570_v32  ;;  %v2103_v49 = vsub.f32 %v46_v62, %v2073_v17  ;;  %v2561_v48 = vand.u32 4294901760, %v2090_v28  ;;  %v2148_v62 = vand.u32 4294901760, %v34_v7 }
  0x6b   :  { %776 = vmatpush.msrb.mxu0 %v2001_v38  ;;  %728 = vmatpush.msra.mxu2 %v561_v19  ;;  %v2077_v19 = vsub.f32 %v50_v2, %v2046_v45  ;;  %v831_v47 = vsub.f32 %v2039_v14, %v2567_v3  ;;  %v837_v39 = vsub.f32 %v2050_v29, %v2565_v9 }
  0x6c   :  { %765 = vmatpush.msra.mxu3 %v1834_v6  ;;  %657 = vmatpush.msra.mxu1 %v1834_v6  ;;  %v825_v6 = vsub.f32 %v2028_v44, %v2568_v21  ;;  %v820_v1 = vand.u32 4294901760, %v819_v20  ;;  %v2560_v31 = vand.u32 4294901760, %v2103_v49  ;;  %v855_v51 = vsub.f32 %v2090_v28, %v2561_v48 }
  0x6d   :  { %778 = vmatpush.msrb.mxu0 %v2008_v12  ;;  %732 = vmatpush.msra.mxu2 %v567_v10  ;;  %v2564_v10 = vand.u32 4294901760, %v2064_v40  ;;  %v2562_v5 = vand.u32 4294901760, %v2077_v19  ;;  %v832_v55 = vand.u32 4294901760, %v831_v47  ;;  %v838_v8 = vand.u32 4294901760, %v837_v39 }
  0x6e   :  { %767 = vmatpush.msra.mxu3 %v1850_v15  ;;  %734 = vmatmul.f32.vlgmr.msra.gmra.mxu2 %v1899_v34  ;;  %v826_v35 = vand.u32 4294901760, %v825_v6  ;;  %v861_v42 = vsub.f32 %v2103_v49, %v2560_v31  ;;  %v867_v6 = vsub.f32 %v2108_v50, %v2558_v24  ;;  %v2159_v47 = vand.u32 4294901760, %v32_v36  ;;  %v86_v24 = vld [vmem:[#allocation2 + $0x1c8] sm:$0xff] }
  0x6f   :  { %780 = vmatpush.msrb.mxu0 %v2015_v60  ;;  %919 = vmatpush.msrb.mxu2 %v2018_v37  ;;  %v843_v57 = vsub.f32 %v2064_v40, %v2564_v10  ;;  %v849_v58 = vsub.f32 %v2077_v19, %v2562_v5  ;;  %v84_v5 = vld [vmem:[#allocation2 + $0x1b8] sm:$0xff] }
  0x70   :  { %659 = vmatpush.msra.mxu1 %v1850_v15  ;;  %769 = vmatpush.msra.mxu3 %v1866_v46  ;;  %v2094_v15 = vand.u32 4294901760, %v42_v61  ;;  %v2221_v9 = vand.u32 4294901760, %v84_v5 }
  0x71   :  { %771 = vmatmul.f32.vlgmr.msra.gmra.mxu3 %v1899_v34  ;;  %782 = vmatpush.msrb.mxu0 %v2025_v30  ;;  %v844_v23 = vand.u32 4294901760, %v843_v57  ;;  %v850_v2 = vand.u32 4294901760, %v849_v58  ;;  %v862_v57 = vand.u32 4294901760, %v861_v42  ;;  %v2177_v58 = vsub.f32 %v34_v7, %v2148_v62 }
  0x72   :  { %922 = vmatpush.msrb.mxu2 %v2028_v44  ;;  %972 = vmatpush.msrb.mxu3 %v2001_v38  ;;  %v2120_v18 = vsub.f32 %v42_v61, %v2094_v15  ;;  %v30_v61 = vld [vmem:[#allocation2 + $0x8] sm:$0xff]  ;;  %v2629_v34 = vand.u32 4294901760, %v2018_v37 }
  0x73   :  { %661 = vmatpush.msra.mxu1 %v1866_v46  ;;  %784 = vmatpush.msrb.mxu0 %v2035_v13  ;;  %v38_v46 = vld [vmem:[#allocation2 + $0x48] sm:$0xff] }
  0x74   :  { %665 = vmatmul.f32.vlgmr.msra.gmra.mxu1 %v1934_v41  ;;  %925 = vmatpush.msrb.mxu2 %v2039_v14  ;;  %v2126_v33 = vand.u32 4294901760, %v38_v46  ;;  %v2557_v27 = vand.u32 4294901760, %v2120_v18 }
  0x75   :  { %821 = vmatpush.msrb.mxu1 %v820_v1  ;;  %974 = vmatpush.msrb.mxu3 %v2008_v12  ;;  %v856_v1 = vand.u32 4294901760, %v855_v51  ;;  %v88_v51 = vld [vmem:[#allocation2 + $0x1d8] sm:$0xff] }
  0x76   :  { %786 = vmatpush.msrb.mxu0 %v2046_v45  ;;  %928 = vmatpush.msrb.mxu2 %v2050_v29  ;;  %v2151_v20 = vsub.f32 %v38_v46, %v2126_v33  ;;  %v873_v39 = vsub.f32 %v2120_v18, %v2557_v27  ;;  %v2170_v46 = vand.u32 4294901760, %v92_v53  ;;  %v2187_v27 = vsub.f32 %v32_v36, %v2159_v47 }
  0x77   :  { %827 = vmatpush.msrb.mxu1 %v826_v35  ;;  %976 = vmatpush.msrb.mxu3 %v2015_v60  ;;  %v2163_v35 = vsub.f32 %v36_v43, %v2136_v54  ;;  %v2569_v36 = vand.u32 4294901760, %v2177_v58  ;;  %v2204_v48 = vand.u32 4294901760, %v88_v51 }
  0x78   :  { %788 = vmatpush.msrb.mxu0 %v2060_v22  ;;  %931 = vmatpush.msrb.mxu2 %v2064_v40  ;;  %v2563_v43 = vand.u32 4294901760, %v2151_v20 }
  0x79   :  { %833 = vmatpush.msrb.mxu1 %v832_v55  ;;  %978 = vmatpush.msrb.mxu3 %v2025_v30  ;;  %v90_v55 = vld [vmem:[#allocation2 + $0x1e8] sm:$0xff]  ;;  %v2566_v42 = vand.u32 4294901760, %v2163_v35  ;;  %v2229_v3 = vsub.f32 %v88_v51, %v2204_v48 }
  0x7a   :  { %790 = vmatpush.msrb.mxu0 %v2073_v17  ;;  %934 = vmatpush.msrb.mxu2 %v2077_v19  ;;  %v2189_v7 = vand.u32 4294901760, %v90_v55 }
  0x7b   :  { %839 = vmatpush.msrb.mxu1 %v838_v8  ;;  %980 = vmatpush.msrb.mxu3 %v2035_v13  ;;  %v2173_v8 = vand.u32 4294901760, %v30_v61 }
  0x7c   :  { %792 = vmatpush.msrb.mxu0 %v2081_v25  ;;  %937 = vmatpush.msrb.mxu2 %v2090_v28  ;;  %2628 = vst [vmem:[#allocation12_spill] sm:$0xff] %v2189_v7 }
  0x7d   :  { %845 = vmatpush.msrb.mxu1 %v844_v23  ;;  %982 = vmatpush.msrb.mxu3 %v2046_v45  ;;  %2627 = vst [vmem:[#allocation5_spill] sm:$0xff] %v2173_v8  ;;  %v868_v23 = vand.u32 4294901760, %v867_v6  ;;  %v874_v6 = vand.u32 4294901760, %v873_v39  ;;  %v2202_v31 = vsub.f32 %v30_v61, %v2173_v8  ;;  %v2571_v61 = vand.u32 4294901760, %v2187_v27 }
  0x7e   :  { %794 = vmatpush.msrb.mxu0 %v2094_v15  ;;  %940 = vmatpush.msrb.mxu2 %v2103_v49 }
  0x7f   :  { %851 = vmatpush.msrb.mxu1 %v850_v2  ;;  %984 = vmatpush.msrb.mxu3 %v2060_v22  ;;  %v879_v2 = vsub.f32 %v2139_v56, %v2559_v52  ;;  %v885_v52 = vsub.f32 %v2151_v20, %v2563_v43  ;;  %v2216_v43 = vsub.f32 %v90_v55, %v2189_v7  ;;  %v2577_v55 = vand.u32 4294901760, %v2202_v31 }
  0x80   :  { %796 = vmatpush.msrb.mxu0 %v2114_v63  ;;  %943 = vmatpush.msrb.mxu2 %v2108_v50 }
  0x81   :  { %857 = vmatpush.msrb.mxu1 %v856_v1  ;;  %986 = vmatpush.msrb.mxu3 %v2073_v17  ;;  %v2194_v1 = vsub.f32 %v92_v53, %v2170_v46  ;;  %v2208_v53 = vand.u32 4294901760, %v86_v24  ;;  %v880_v39 = vand.u32 4294901760, %v879_v2  ;;  %v886_v2 = vand.u32 4294901760, %v885_v52 }
  0x82   :  { %798 = vmatpush.msrb.mxu0 %v2126_v33  ;;  %946 = vmatpush.msrb.mxu2 %v2120_v18  ;;  %v909_v32 = vsub.f32 %v2202_v31, %v2577_v55 }
  0x83   :  { %863 = vmatpush.msrb.mxu1 %v862_v57  ;;  %988 = vmatpush.msrb.mxu3 %v2081_v25  ;;  %v891_v57 = vsub.f32 %v2163_v35, %v2566_v42  ;;  %v2576_v10 = vand.u32 4294901760, %v2194_v1  ;;  %v897_v42 = vsub.f32 %v2177_v58, %v2569_v36  ;;  %v2234_v21 = vsub.f32 %v86_v24, %v2208_v53 }
  0x84   :  { %800 = vmatpush.msrb.mxu0 %v2136_v54  ;;  %949 = vmatpush.msrb.mxu2 %v2139_v56  ;;  %v903_v36 = vsub.f32 %v2187_v27, %v2571_v61 }
  0x85   :  { %869 = vmatpush.msrb.mxu1 %v868_v23  ;;  %990 = vmatpush.msrb.mxu3 %v2094_v15  ;;  %v82_v23 = vld [vmem:[#allocation2 + $0x1a8] sm:$0xff]  ;;  %v892_v52 = vand.u32 4294901760, %v891_v57  ;;  %v1160_v24 = vsub.f32 %v2194_v1, %v2576_v10  ;;  %v898_v61 = vand.u32 4294901760, %v897_v42  ;;  %v76_v10 = vld [vmem:[#allocation2 + $0x178] sm:$0xff] }
  0x86   :  { %802 = vmatpush.msrb.mxu0 %v2148_v62  ;;  %952 = vmatpush.msrb.mxu2 %v2151_v20  ;;  %v2241_v51 = vand.u32 4294901760, %v82_v23  ;;  %v78_v57 = vld [vmem:[#allocation2 + $0x188] sm:$0xff]  ;;  %v904_v42 = vand.u32 4294901760, %v903_v36  ;;  %v910_v36 = vand.u32 4294901760, %v909_v32  ;;  %v2282_v59 = vand.u32 4294901760, %v76_v10 }
  0x87   :  { %875 = vmatpush.msrb.mxu1 %v874_v6  ;;  %992 = vmatpush.msrb.mxu3 %v2114_v63  ;;  %v80_v6 = vld [vmem:[#allocation2 + $0x198] sm:$0xff]  ;;  %v2269_v11 = vand.u32 4294901760, %v78_v57  ;;  %v1161_v37 = vand.u32 4294901760, %v1160_v24  ;;  %v2634_v24 = vand.u32 4294901760, %v2234_v21 }
  0x88   :  { %804 = vmatpush.msrb.mxu0 %v2159_v47  ;;  %955 = vmatpush.msrb.mxu2 %v2163_v35  ;;  %v2256_v4 = vand.u32 4294901760, %v80_v6  ;;  %v2267_v41 = vsub.f32 %v82_v23, %v2241_v51 }
  0x89   :  { %881 = vmatpush.msrb.mxu1 %v880_v39  ;;  %994 = vmatpush.msrb.mxu3 %v2126_v33  ;;  %v2249_v39 = vsub.f32 %v84_v5, %v2221_v9  ;;  %v74_v5 = vld [vmem:[#allocation2 + $0x168] sm:$0xff] }
  0x8a   :  { %806 = vmatpush.msrb.mxu0 %v2173_v8  ;;  %958 = vmatpush.msrb.mxu2 %v2177_v58  ;;  %v2280_v16 = vsub.f32 %v80_v6, %v2256_v4  ;;  %v2293_v6 = vsub.f32 %v78_v57, %v2269_v11  ;;  %v2305_v57 = vsub.f32 %v76_v10, %v2282_v59 }
  0x8b   :  { %887 = vmatpush.msrb.mxu1 %v886_v2  ;;  %996 = vmatpush.msrb.mxu3 %v2136_v54  ;;  %v2630_v2 = vand.u32 4294901760, %v2216_v43 }
  0x8c   :  { %1013 = vmatpush.msra.mxu0 %v2629_v34  ;;  %961 = vmatpush.msrb.mxu2 %v2187_v27  ;;  %v2631_v34 = vand.u32 4294901760, %v2028_v44  ;;  %v2633_v44 = vand.u32 4294901760, %v2039_v14  ;;  %v2635_v14 = vand.u32 4294901760, %v2050_v29  ;;  %v2637_v29 = vand.u32 4294901760, %v2064_v40 }
  0x8d   :  { %893 = vmatpush.msrb.mxu1 %v892_v52  ;;  %998 = vmatpush.msrb.mxu3 %v2148_v62  ;;  %v1166_v55 = vsub.f32 %v2216_v43, %v2630_v2  ;;  %v2632_v2 = vand.u32 4294901760, %v2229_v3  ;;  %v2295_v52 = vand.u32 4294901760, %v74_v5  ;;  %v2639_v40 = vand.u32 4294901760, %v2077_v19 }
  0x8e   :  { %1017 = vmatpush.msra.mxu0 %v2631_v34  ;;  %964 = vmatpush.msrb.mxu2 %v2202_v31  ;;  %v72_v34 = vld [vmem:[#allocation2 + $0x158] sm:$0xff]  ;;  %v2640_v19 = vand.u32 4294901760, %v2090_v28 }
  0x8f   :  { %899 = vmatpush.msrb.mxu1 %v898_v61  ;;  %1000 = vmatpush.msrb.mxu3 %v2159_v47  ;;  %v1172_v23 = vsub.f32 %v2229_v3, %v2632_v2  ;;  %v1178_v61 = vsub.f32 %v2234_v21, %v2634_v24  ;;  %v1167_v32 = vand.u32 4294901760, %v1166_v55  ;;  %v2585_v2 = vand.u32 4294901760, %v2280_v16 }
  0x90   :  { %1021 = vmatpush.msra.mxu0 %v2633_v44  ;;  %1117 = vmatpush.msra.mxu2 %v2170_v46  ;;  %v2636_v44 = vand.u32 4294901760, %v2249_v39  ;;  %v2318_v10 = vsub.f32 %v74_v5, %v2295_v52 }
  0x91   :  { %905 = vmatpush.msrb.mxu1 %v904_v42  ;;  %1002 = vmatpush.msrb.mxu3 %v2173_v8  ;;  %v70_v42 = vld [vmem:[#allocation2 + $0x148] sm:$0xff]  ;;  %v1173_v55 = vand.u32 4294901760, %v1172_v23  ;;  %v2307_v8 = vand.u32 4294901760, %v72_v34  ;;  %v1201_v23 = vand.u32 4294901760, %v2293_v6 }
  0x92   :  { %1025 = vmatpush.msra.mxu0 %v2635_v14  ;;  %1119 = vmatpush.msra.mxu2 %v2189_v7  ;;  %v1184_v24 = vsub.f32 %v2249_v39, %v2636_v44  ;;  %v1179_v14 = vand.u32 4294901760, %v1178_v61  ;;  %v68_v7 = vld [vmem:[#allocation2 + $0x138] sm:$0xff]  ;;  %v2320_v44 = vand.u32 4294901760, %v70_v42  ;;  %v1196_v61 = vsub.f32 %v2280_v16, %v2585_v2 }
  0x93   :  { %1162 = vmatpush.msra.mxu3 %v1161_v37  ;;  %911 = vmatpush.msrb.mxu1 %v910_v36  ;;  %v2638_v37 = vand.u32 4294901760, %v2267_v41  ;;  %v2331_v5 = vsub.f32 %v72_v34, %v2307_v8  ;;  %v2641_v2 = vand.u32 4294901760, %v2103_v49  ;;  %v2642_v49 = vand.u32 4294901760, %v2108_v50 }
  0x94   :  { %1029 = vmatpush.msra.mxu0 %v2637_v29  ;;  %1121 = vmatpush.msra.mxu2 %v2204_v48  ;;  %v2333_v29 = vand.u32 4294901760, %v68_v7  ;;  %v2344_v34 = vsub.f32 %v70_v42, %v2320_v44  ;;  %v1197_v28 = vand.u32 4294901760, %v1196_v61 }
  0x95   :  { %1080 = vmatpush.msra.mxu1 %v2001_v38  ;;  %1168 = vmatpush.msra.mxu3 %v1167_v32  ;;  %v1190_v36 = vsub.f32 %v2267_v41, %v2638_v37  ;;  %v1185_v38 = vand.u32 4294901760, %v1184_v24  ;;  %v1207_v32 = vand.u32 4294901760, %v2305_v57  ;;  %v66_v37 = vld [vmem:[#allocation2 + $0x128] sm:$0xff]  ;;  %v1202_v24 = vsub.f32 %v2293_v6, %v1201_v23 }
  0x96   :  { %1033 = vmatpush.msra.mxu0 %v2639_v40  ;;  %1123 = vmatpush.msra.mxu2 %v2208_v53  ;;  %v64_v40 = vld [vmem:[#allocation2 + $0x118] sm:$0xff]  ;;  %v2357_v42 = vsub.f32 %v68_v7, %v2333_v29  ;;  %v2643_v7 = vand.u32 4294901760, %v2120_v18  ;;  %v2644_v18 = vand.u32 4294901760, %v2139_v56 }
  0x97   :  { %1082 = vmatpush.msra.mxu1 %v2008_v12  ;;  %1174 = vmatpush.msra.mxu3 %v1173_v55  ;;  %v1191_v12 = vand.u32 4294901760, %v1190_v36  ;;  %v1213_v55 = vand.u32 4294901760, %v2318_v10  ;;  %v1219_v36 = vand.u32 4294901760, %v2331_v5 }
  0x98   :  { %1037 = vmatpush.msra.mxu0 %v2640_v19  ;;  %1125 = vmatpush.msra.mxu2 %v2221_v9  ;;  %v1225_v19 = vand.u32 4294901760, %v2344_v34 }
  0x99   :  { %1084 = vmatpush.msra.mxu1 %v2015_v60  ;;  %1180 = vmatpush.msra.mxu3 %v1179_v14  ;;  %v2349_v60 = vand.u32 4294901760, %v66_v37  ;;  %v1208_v14 = vsub.f32 %v2305_v57, %v1207_v32  ;;  %v1214_v61 = vsub.f32 %v2318_v10, %v1213_v55 }
  0x9a   :  { %1041 = vmatpush.msra.mxu0 %v2641_v2  ;;  %1127 = vmatpush.msra.mxu2 %v2241_v51  ;;  %v62_v2 = vld [vmem:[#allocation2 + $0x108] sm:$0xff] }
  0x9b   :  { %1086 = vmatpush.msra.mxu1 %v2025_v30  ;;  %1186 = vmatpush.msra.mxu3 %v1185_v38  ;;  %v2362_v30 = vand.u32 4294901760, %v64_v40  ;;  %v1203_v38 = vand.u32 4294901760, %v1202_v24  ;;  %v1209_v50 = vand.u32 4294901760, %v1208_v14  ;;  %v1231_v24 = vand.u32 4294901760, %v2357_v42 }
  0x9c   :  { %1045 = vmatpush.msra.mxu0 %v2642_v49  ;;  %1129 = vmatpush.msra.mxu2 %v2256_v4  ;;  %v2380_v49 = vand.u32 4294901760, %v62_v2  ;;  %v2645_v14 = vand.u32 4294901760, %v2151_v20 }
  0x9d   :  { %1088 = vmatpush.msra.mxu1 %v2035_v13  ;;  %1192 = vmatpush.msra.mxu3 %v1191_v12  ;;  %v2373_v13 = vsub.f32 %v66_v37, %v2349_v60  ;;  %v1220_v12 = vsub.f32 %v2331_v5, %v1219_v36  ;;  %v1215_v37 = vand.u32 4294901760, %v1214_v61  ;;  %v2646_v61 = vand.u32 4294901760, %v2163_v35 }
  0x9e   :  { %1049 = vmatpush.msra.mxu0 %v2643_v7  ;;  %1131 = vmatpush.msra.mxu2 %v2269_v11  ;;  %v2647_v7 = vand.u32 4294901760, %v2177_v58 }
  0x9f   :  { %1090 = vmatpush.msra.mxu1 %v2046_v45  ;;  %1198 = vmatpush.msra.mxu3 %v1197_v28  ;;  %v2386_v45 = vsub.f32 %v64_v40, %v2362_v30  ;;  %v1226_v28 = vsub.f32 %v2344_v34, %v1225_v19  ;;  %v1237_v56 = vand.u32 4294901760, %v2373_v13  ;;  %v1232_v40 = vsub.f32 %v2357_v42, %v1231_v24 }
  0xa0   :  { %1053 = vmatpush.msra.mxu0 %v2644_v18  ;;  %1133 = vmatpush.msra.mxu2 %v2282_v59  ;;  %v2657_v18 = vld [vmem:[#allocation11_spill] sm:$0xff] }
  0xa1   :  { %1092 = vmatpush.msra.mxu1 %v2060_v22  ;;  %1204 = vmatpush.msra.mxu3 %v1203_v38  ;;  %v1221_v22 = vand.u32 4294901760, %v1220_v12  ;;  %v2401_v38 = vsub.f32 %v62_v2, %v2380_v49  ;;  %v1227_v20 = vand.u32 4294901760, %v1226_v28  ;;  %v1238_v2 = vsub.f32 %v2373_v13, %v1237_v56 }
  0xa2   :  { %1057 = vmatpush.msra.mxu0 %v2645_v14  ;;  %1135 = vmatpush.msra.mxu2 %v2295_v52  ;;  %v1233_v35 = vand.u32 4294901760, %v1232_v40 }
  0xa3   :  { %1094 = vmatpush.msra.mxu1 %v2073_v17  ;;  %1210 = vmatpush.msra.mxu3 %v1209_v50  ;;  %v1243_v17 = vand.u32 4294901760, %v2386_v45  ;;  %v2648_v50 = vand.u32 4294901760, %v2187_v27  ;;  %v1239_v12 = vand.u32 4294901760, %v1238_v2 }
  0xa4   :  { %1061 = vmatpush.msra.mxu0 %v2646_v61  ;;  %1137 = vmatpush.msra.mxu2 %v2307_v8 }
  0xa5   :  { %1096 = vmatpush.msra.mxu1 %v2081_v25  ;;  %1216 = vmatpush.msra.mxu3 %v1215_v37  ;;  %v1249_v25 = vand.u32 4294901760, %v2401_v38  ;;  %v1244_v58 = vsub.f32 %v2386_v45, %v1243_v17  ;;  %v2659_v37 = vld [vmem:[#allocation8_spill] sm:$0xff] }
  0xa6   :  { %1065 = vmatpush.msra.mxu0 %v2647_v7  ;;  %1139 = vmatpush.msra.mxu2 %v2320_v44 }
  0xa7   :  { %1098 = vmatpush.msra.mxu1 %v2094_v15  ;;  %1222 = vmatpush.msra.mxu3 %v1221_v22  ;;  %v2649_v15 = vand.u32 4294901760, %v2202_v31  ;;  %v1245_v27 = vand.u32 4294901760, %v1244_v58  ;;  %v2650_v31 = vld [vmem:[#allocation7_spill] sm:$0xff] }
  0xa8   :  { %1069 = vmatpush.msra.mxu0 %v2648_v50  ;;  %1141 = vmatpush.msra.mxu2 %v2333_v29 }
  0xa9   :  { %1100 = vmatpush.msra.mxu1 %v2114_v63  ;;  %1228 = vmatpush.msra.mxu3 %v1227_v20  ;;  %v1250_v63 = vsub.f32 %v2401_v38, %v1249_v25 }
  0xaa   :  { %1073 = vmatpush.msra.mxu0 %v2649_v15  ;;  %1143 = vmatpush.msra.mxu2 %v2349_v60 }
  0xab   :  { %1102 = vmatpush.msra.mxu1 %v2126_v33  ;;  %1234 = vmatpush.msra.mxu3 %v1233_v35  ;;  %v1251_v33 = vand.u32 4294901760, %v1250_v63 }
  0xac   :  { %812 = vmatmul.f32.vlgmr.msrb.gmra.mxu0 %v1913_v26  ;;  %1145 = vmatpush.msra.mxu2 %v2362_v30  ;;  %v2651_v26 = vand.u32 4294901760, %v2194_v1 }
  0xad   :  { %1104 = vmatpush.msra.mxu1 %v2136_v54  ;;  %1260 = vmatpush.msrb.mxu0 %v2194_v1  ;;  %v2652_v54 = vld [vmem:[#allocation6_spill] sm:$0xff]  ;;  %v2655_v1 = vand.u32 4294901760, %v2229_v3 }
  0xae   :  { %1240 = vmatpush.msra.mxu3 %v1239_v12  ;;  %967 = vmatmul.f32.vlgmr.msrb.gmra.mxu2 %v1848_v0  ;;  %v2653_v0 = vand.u32 4294901760, %v2216_v43 }
  0xaf   :  { %1263 = vmatpush.msrb.mxu0 %v2216_v43  ;;  %1106 = vmatpush.msra.mxu1 %v2148_v62  ;;  %v2654_v62 = vld [vmem:[#allocation5_spill] sm:$0xff]  ;;  %v2658_v43 = vand.u32 4294901760, %v2234_v21 }
  0xb0   :  { %1147 = vmatpush.msra.mxu2 %v2380_v49  ;;  %1246 = vmatpush.msra.mxu3 %v1245_v27 }
  0xb1   :  { %1006 = vmatmul.f32.vlgmr.msrb.gmra.mxu3 %v2650_v31  ;;  %1266 = vmatpush.msrb.mxu0 %v2229_v3  ;;  %v2660_v3 = vand.u32 4294901760, %v2249_v39 }
  0xb2   :  { %1354 = vmatpush.msrb.mxu2 %v2651_v26  ;;  %1108 = vmatpush.msra.mxu1 %v2159_v47  ;;  %v2656_v47 = vld [vmem:[#allocation12_spill] sm:$0xff] }
  0xb3   :  { %1252 = vmatpush.msra.mxu3 %v1251_v33  ;;  %913 = vmatmul.f32.vlgmr.msrb.gmra.mxu1 %v2652_v54 }
  0xb4   :  { %1269 = vmatpush.msrb.mxu0 %v2234_v21  ;;  %1358 = vmatpush.msrb.mxu2 %v2653_v0  ;;  %v2661_v21 = vand.u32 4294901760, %v2267_v41 }
  0xb5   :  { %1421 = vmatpush.msrb.mxu3 %v2170_v46  ;;  %1110 = vmatpush.msra.mxu1 %v2654_v62 }
  0xb6   :  { %1272 = vmatpush.msrb.mxu0 %v2249_v39  ;;  %1362 = vmatpush.msrb.mxu2 %v2655_v1 }
  0xb7   :  { %1313 = vmatpush.msrb.mxu1 %v2170_v46  ;;  %1423 = vmatpush.msrb.mxu3 %v2656_v47 }
  0xb8   :  { %1153 = vmatmul.f32.vlgmr.msra.gmra.mxu2 %v2657_v18  ;;  %1275 = vmatpush.msrb.mxu0 %v2267_v41 }
  0xb9   :  { %1315 = vmatpush.msrb.mxu1 %v2656_v47  ;;  %1366 = vmatpush.msrb.mxu2 %v2658_v43 }
  0xba   :  { %1425 = vmatpush.msrb.mxu3 %v2204_v48  ;;  %1075 = vmatmul.f32.vlgmr.msra.gmra.mxu0 %v2652_v54 }
  0xbb   :  { %1254 = vmatmul.f32.vlgmr.msra.gmra.mxu3 %v2659_v37  ;;  %1278 = vmatpush.msrb.mxu0 %v2280_v16 }
  0xbc   :  { %1317 = vmatpush.msrb.mxu1 %v2204_v48  ;;  %1370 = vmatpush.msrb.mxu2 %v2660_v3  ;;  %v2662_v48 = vand.u32 4294901760, %v2280_v16  ;;  %v2663_v16 = vld [vmem:[#allocation9_spill] sm:$0xff] }
  0xbd   :  { %1427 = vmatpush.msrb.mxu3 %v2208_v53  ;;  %1112 = vmatmul.f32.vlgmr.msra.gmra.mxu1 %v2652_v54 }
  0xbe   :  { %1281 = vmatpush.msrb.mxu0 %v2293_v6  ;;  %1319 = vmatpush.msrb.mxu1 %v2208_v53 }
  0xbf   :  { %1374 = vmatpush.msrb.mxu2 %v2661_v21  ;;  %1429 = vmatpush.msrb.mxu3 %v2221_v9 }
  0xc0   :  { %1284 = vmatpush.msrb.mxu0 %v2305_v57  ;;  %1321 = vmatpush.msrb.mxu1 %v2221_v9 }
  0xc1   :  { %1378 = vmatpush.msrb.mxu2 %v2662_v48  ;;  %1431 = vmatpush.msrb.mxu3 %v2241_v51 }
  0xc2   :  { %1287 = vmatpush.msrb.mxu0 %v2318_v10  ;;  %1323 = vmatpush.msrb.mxu1 %v2241_v51 }
  0xc3   :  { %1382 = vmatpush.msrb.mxu2 %v1201_v23  ;;  %1433 = vmatpush.msrb.mxu3 %v2256_v4 }
  0xc4   :  { %1290 = vmatpush.msrb.mxu0 %v2331_v5  ;;  %1325 = vmatpush.msrb.mxu1 %v2256_v4  ;;  %v131_v4 = vpop.f32.mrf.mxu0 }
  0xc5   :  { %1386 = vmatpush.msrb.mxu2 %v1207_v32  ;;  %1435 = vmatpush.msrb.mxu3 %v2269_v11 }
  0xc6   :  { %1293 = vmatpush.msrb.mxu0 %v2344_v34  ;;  %1327 = vmatpush.msrb.mxu1 %v2269_v11  ;;  %v2664_v11 = vld [vmem:[#allocation10_spill] sm:$0xff] }
  0xc7   :  { %1390 = vmatpush.msrb.mxu2 %v1213_v55  ;;  %1437 = vmatpush.msrb.mxu3 %v2282_v59 }
  0xc8   :  { %1296 = vmatpush.msrb.mxu0 %v2357_v42  ;;  %1329 = vmatpush.msrb.mxu1 %v2282_v59 }
  0xc9   :  { %1394 = vmatpush.msrb.mxu2 %v1219_v36  ;;  %1439 = vmatpush.msrb.mxu3 %v2295_v52 }
  0xca   :  { %1299 = vmatpush.msrb.mxu0 %v2373_v13  ;;  %1331 = vmatpush.msrb.mxu1 %v2295_v52  ;;  %v232_v59 = vpop.f32.mrf.mxu1 }
  0xcb   :  { %1398 = vmatpush.msrb.mxu2 %v1225_v19  ;;  %1441 = vmatpush.msrb.mxu3 %v2307_v8  ;;  %v233_v41 = vadd.f32 %v232_v59, %v131_v4 }
  0xcc   :  { %1302 = vmatpush.msrb.mxu0 %v2386_v45  ;;  %1333 = vmatpush.msrb.mxu1 %v2307_v8  ;;  %v286_v9 = vpop.f32.mrf.mxu2  ;;  %v325_v8 = vpop.f32.mrf.mxu3 }
  0xcd   :  { %1402 = vmatpush.msrb.mxu2 %v1231_v24  ;;  %1443 = vmatpush.msrb.mxu3 %v2320_v44  ;;  %v287_v46 = vadd.f32 %v286_v9, %v233_v41 }
  0xce   :  { %1305 = vmatpush.msrb.mxu0 %v2401_v38  ;;  %1335 = vmatpush.msrb.mxu1 %v2320_v44 }
  0xcf   :  { %1406 = vmatpush.msrb.mxu2 %v1237_v56  ;;  %1445 = vmatpush.msrb.mxu3 %v2333_v29  ;;  %v326_v53 = vadd.f32 %v325_v8, %v287_v46 }
  0xd0   :  { %1308 = vmatmul.f32.vlgmr.msrb.gmra.mxu0 %v2663_v16  ;;  %1337 = vmatpush.msrb.mxu1 %v2333_v29 }
  0xd1   :  { %1410 = vmatpush.msrb.mxu2 %v1243_v17  ;;  %1447 = vmatpush.msrb.mxu3 %v2349_v60  ;;  %v394_v51 = vpop.f32.mrf.mxu0 }
  0xd2   :  { %1339 = vmatpush.msrb.mxu1 %v2349_v60  ;;  %v395_v39 = vadd.f32 %v394_v51, %v326_v53 }
  0xd3   :  { %1414 = vmatpush.msrb.mxu2 %v1249_v25  ;;  %1449 = vmatpush.msrb.mxu3 %v2362_v30 }
  0xd4   :  { %1416 = vmatmul.f32.vlgmr.msrb.gmra.mxu2 %v2659_v37  ;;  %1341 = vmatpush.msrb.mxu1 %v2362_v30  ;;  %v431_v52 = vpop.f32.mrf.mxu1 }
  0xd5   :  { %1451 = vmatpush.msrb.mxu3 %v2380_v49  ;;  %v432_v6 = vadd.f32 %v431_v52, %v395_v39  ;;  %v472_v57 = vpop.f32.mrf.mxu2 }
  0xd6   :  { %1453 = vmatmul.f32.vlgmr.msrb.gmra.mxu3 %v2659_v37  ;;  %1343 = vmatpush.msrb.mxu1 %v2380_v49 }
  0xd7   :  { %1347 = vmatmul.f32.vlgmr.msrb.gmra.mxu1 %v2664_v11  ;;  %v473_v23 = vadd.f32 %v472_v57, %v432_v6 }
  0xd8   :  { %v573_v10 = vpop.f32.mrf.mxu3 }
  0xd9   :  { %v574_v32 = vadd.f32 %v573_v10, %v473_v23 }
  0xe7   :  { %v627_v44 = vpop.f32.mrf.mxu0 }
  0xe8   :  { %v628_v5 = vadd.f32 %v627_v44, %v574_v32 }
  0xf1   :  { %v666_v29 = vpop.f32.mrf.mxu1  ;;  %v735_v55 = vpop.f32.mrf.mxu2 }
  0xf2   :  { %v667_v34 = vadd.f32 %v666_v29, %v628_v5 }
  0xf4   :  { %v736_v60 = vadd.f32 %v735_v55, %v667_v34  ;;  %v772_v36 = vpop.f32.mrf.mxu3 }
  0xf6   :  { %v773_v42 = vadd.f32 %v772_v36, %v736_v60 }
  0xf8   :  { %1457 = vst [vmem:[%s2536_s2] sm:$0xff] %v773_v42 }
 0x129   :  { %v813_v19 = vpop.f32.mrf.mxu0 }
 0x130   :  { %v914_v30 = vpop.f32.mrf.mxu1 }
 0x131   :  { %v915_v13 = vadd.f32 %v914_v30, %v813_v19  ;;  %v968_v24 = vpop.f32.mrf.mxu2 }
 0x133   :  { %v969_v49 = vadd.f32 %v968_v24, %v915_v13 }
 0x134   :  { %v1007_v45 = vpop.f32.mrf.mxu3 }
 0x135   :  { %v1008_v28 = vadd.f32 %v1007_v45, %v969_v49 }
 0x137   :  { %v1076_v14 = vpop.f32.mrf.mxu0 }
 0x138   :  { %v1077_v56 = vadd.f32 %v1076_v14, %v1008_v28 }
 0x13a   :  { %v1113_v22 = vpop.f32.mrf.mxu1 }
 0x13b   :  { %v1114_v40 = vadd.f32 %v1113_v22, %v1077_v56  ;;  %v1154_v38 = vpop.f32.mrf.mxu2 }
 0x13d   :  { %v1155_v61 = vadd.f32 %v1154_v38, %v1114_v40 }
 0x13e   :  { %v1255_v17 = vpop.f32.mrf.mxu3 }
 0x13f   :  { %v1256_v7 = vadd.f32 %v1255_v17, %v1155_v61 }
 0x14d   :  { %v1309_v20 = vpop.f32.mrf.mxu0 }
 0x14e   :  { %v1310_v2 = vadd.f32 %v1309_v20, %v1256_v7 }
 0x154   :  { %v1348_v35 = vpop.f32.mrf.mxu1 }
 0x155   :  { %v1349_v25 = vadd.f32 %v1348_v35, %v1310_v2 }
 0x157   :  { %v1417_v50 = vpop.f32.mrf.mxu2 }
 0x158   :  { %v1418_v58 = vadd.f32 %v1417_v50, %v1349_v25 }
 0x159   :  { %v1454_v15 = vpop.f32.mrf.mxu3 }
 0x15a   :  { %v1455_v12 = vadd.f32 %v1454_v15, %v1418_v58 }
 0x15c   :  { %1458 = vst [vmem:[%s2536_s2 + $0x8] sm:$0xff] %v1455_v12 }
 0x15d   :  { %1463 = vsyncpa [#allocation3], 1 }

</bundles_post_ra>
